<compile_context>
chip_gen: v5e
topology: v5e:2x2
jax: 0.10.0
libtpu: 0.0.40
codegen_flags: <defaults>
</compile_context>

<pallas_src>
import functools

import jax
import jax.numpy as jnp
from jax.experimental import pallas as pl
from jax.experimental.pallas import tpu as pltpu


def lstm_kernel(x_ref, w_ih_ref, w_hh_ref, b_ref, out_ref, hn_ref, cn_ref, *, B, T):
    H4 = w_ih_ref.shape[1]
    H = H4 // 4

    w_ih = w_ih_ref[...]          # (I, 4H)  i/f/o columns pre-scaled by 0.5
    w_hh = w_hh_ref[...]          # (H, 4H)  i/f/o columns pre-scaled by 0.5
    b = b_ref[...]                # (1, 4H)  == (b_ih + b_hh), same pre-scaling

    # ---- Prologue: one big time-major input projection with the bias folded in.
    xw = jnp.dot(x_ref[...], w_ih, preferred_element_type=jnp.float32) + b  # (T*B, 4H)

    h = jnp.zeros((B, H), jnp.float32)
    c = jnp.zeros((B, H), jnp.float32)

    # T is small and static -> unrolled Python loop over the serial recurrence.
    for t in range(T):
        # Only the hidden-state matmul sits on the per-step critical path.
        gates = xw[t * B:(t + 1) * B, :] + jnp.dot(
            h, w_hh, preferred_element_type=jnp.float32)        # (B, 4H)

        # Single EUP pass (tanh) over the full 64-lane gates value.  Because
        # the i/f/o columns were pre-scaled by 0.5, the sigmoid gates fall out
        # of the same tanh via one fused multiply-add: sigmoid(z)=0.5*tanh(z/2)+0.5.
        th = jnp.tanh(gates)
        sg = th * 0.5 + 0.5
        i_g = sg[:, 0 * H:1 * H]
        f_g = sg[:, 1 * H:2 * H]
        g_g = th[:, 2 * H:3 * H]
        o_g = sg[:, 3 * H:4 * H]

        c = f_g * c + i_g * g_g
        h = o_g * jnp.tanh(c)

        # Per-step store: off the h->h dependency chain, overlaps the next
        # step's matmul, and avoids holding T long-lived h vregs for a stack.
        out_ref[t * B:(t + 1) * B, :] = h.astype(out_ref.dtype)

    hn_ref[0, :, :] = h.astype(hn_ref.dtype)
    cn_ref[0, :, :] = c.astype(cn_ref.dtype)


def prepare_lstm_params(weight_ih, weight_hh, bias_ih, bias_hh):
    """One-time parameter prep (hoisted out of the per-call forward).

    weight_ih: (4H, I), weight_hh: (4H, H), bias_ih/bias_hh: (4H,) (PyTorch shapes).
    Returns W_ih^T (I, 4H), W_hh^T (H, 4H), combined bias (1, 4H), with the
    i/f/o gate columns pre-scaled by 0.5 (exact power-of-two scaling) so the
    kernel needs a single tanh pass per step: sigmoid(z) = 0.5*tanh(z/2) + 0.5.
    """
    H4 = weight_ih.shape[0]
    H = H4 // 4
    scale = jnp.concatenate([
        jnp.full((H,), 0.5, jnp.float32),   # i gate
        jnp.full((H,), 0.5, jnp.float32),   # f gate
        jnp.ones((H,), jnp.float32),        # g gate (stays tanh)
        jnp.full((H,), 0.5, jnp.float32),   # o gate
    ])
    w_ih_t = jnp.transpose(weight_ih) * scale[None, :]   # (I, 4H)
    w_hh_t = jnp.transpose(weight_hh) * scale[None, :]   # (H, 4H)
    b = ((bias_ih + bias_hh) * scale).reshape(1, -1)     # (1, 4H)
    return w_ih_t, w_hh_t, b


@jax.jit
def lstm_forward(x, w_ih_t, w_hh_t, b):
    """Mirrors torch.nn.LSTM(batch_first=True) forward: returns (output, (h_n, c_n)).

    x: (B, T, I) float32; weights pre-transposed/pre-scaled by prepare_lstm_params.
    """
    B, T, I = x.shape
    H = w_hh_t.shape[0]

    # Time-major flatten: row t*B + b' is (step t, batch b').  Metadata-only
    # for B=1; keeps the kernel free of any in-kernel reshape / relayout.
    x_tm = jnp.transpose(x, (1, 0, 2)).reshape(T * B, I)

    out_tm, h_n, c_n = pl.pallas_call(
        functools.partial(lstm_kernel, B=B, T=T),
        out_shape=(
            jax.ShapeDtypeStruct((T * B, H), jnp.float32),  # time-major seq output
            jax.ShapeDtypeStruct((1, B, H), jnp.float32),   # h_n (num_layers=1)
            jax.ShapeDtypeStruct((1, B, H), jnp.float32),   # c_n
        ),
        in_specs=[pl.BlockSpec(memory_space=pltpu.MemorySpace.VMEM)] * 4,
        out_specs=(pl.BlockSpec(memory_space=pltpu.MemorySpace.VMEM),) * 3,
    )(x_tm, w_ih_t, w_hh_t, b)

    # Back to batch-first (B, T, H); metadata-only for B=1.
    output = jnp.transpose(out_tm.reshape(T, B, H), (1, 0, 2))
    return output, (h_n, c_n)


def lstm_reference(x, weight_ih, weight_hh, bias_ih, bias_hh):
    """Pure-JAX reference matching torch.nn.LSTM semantics (correctness check)."""
    B, T, I = x.shape
    H = weight_hh.shape[1]
    b = bias_ih + bias_hh

    def step(carry, x_t):
        h, c = carry
        gates = x_t @ weight_ih.T + h @ weight_hh.T + b
        i_g = jax.nn.sigmoid(gates[:, 0 * H:1 * H])
        f_g = jax.nn.sigmoid(gates[:, 1 * H:2 * H])
        g_g = jnp.tanh(gates[:, 2 * H:3 * H])
        o_g = jax.nn.sigmoid(gates[:, 3 * H:4 * H])
        c = f_g * c + i_g * g_g
        h = o_g * jnp.tanh(c)
        return (h, c), h

    h0 = jnp.zeros((B, H), jnp.float32)
    c0 = jnp.zeros((B, H), jnp.float32)
    (h_n, c_n), ys = jax.lax.scan(step, (h0, c0), jnp.transpose(x, (1, 0, 2)))
    return jnp.transpose(ys, (1, 0, 2)), (h_n[None], c_n[None])


if __name__ == "__main__":
    # Shapes implied by the module: input_size=8, hidden_size=16, x = (1, 10, 8).
    B, T, I, H = 1, 10, 8, 16

    key = jax.random.PRNGKey(0)
    kx, k1, k2, k3, k4 = jax.random.split(key, 5)

    # Deterministic parameter init (PyTorch-style uniform(-1/sqrt(H), 1/sqrt(H))).
    bound = 1.0 / jnp.sqrt(jnp.float32(H))
    weight_ih = jax.random.uniform(k1, (4 * H, I), jnp.float32, -bound, bound)
    weight_hh = jax.random.uniform(k2, (4 * H, H), jnp.float32, -bound, bound)
    bias_ih = jax.random.uniform(k3, (4 * H,), jnp.float32, -bound, bound)
    bias_hh = jax.random.uniform(k4, (4 * H,), jnp.float32, -bound, bound)

    x = jax.random.uniform(kx, (B, T, I), jnp.float32)

    # Parameter prep happens once (weights-change time), not per forward call.
    w_ih_t, w_hh_t, b = prepare_lstm_params(weight_ih, weight_hh, bias_ih, bias_hh)

    output, (h_n, c_n) = jax.block_until_ready(lstm_forward(x, w_ih_t, w_hh_t, b))

    ref_out, (ref_hn, ref_cn) = lstm_reference(x, weight_ih, weight_hh, bias_ih, bias_hh)

    assert output.shape == (B, T, H)
    assert h_n.shape == (1, B, H) and c_n.shape == (1, B, H)
    assert jnp.allclose(output, ref_out, atol=1e-5, rtol=1e-5)
    assert jnp.allclose(h_n, ref_hn, atol=1e-5, rtol=1e-5)
    assert jnp.allclose(c_n, ref_cn, atol=1e-5, rtol=1e-5)

    print("KERNEL_OK")
</pallas_src>

<mosaic_0001>
module attributes {stable_mosaic.version = 11 : i64} {
  func.func @lstm_kernel(%arg0: memref<10x8xf32, #tpu.memory_space<vmem>>, %arg1: memref<8x64xf32, #tpu.memory_space<vmem>>, %arg2: memref<16x64xf32, #tpu.memory_space<vmem>>, %arg3: memref<1x64xf32, #tpu.memory_space<vmem>>, %arg4: memref<10x16xf32, #tpu.memory_space<vmem>>, %arg5: memref<1x1x16xf32, #tpu.memory_space<vmem>>, %arg6: memref<1x1x16xf32, #tpu.memory_space<vmem>>) attributes {dimension_semantics = [], scalar_prefetch = 0 : i64, scratch_operands = 0 : i64, tpu.core_type = #tpu.core_type<tc>} {
    %c0 = arith.constant 0 : index
    %c0_0 = arith.constant 0 : index
    %0 = vector.load %arg1[%c0, %c0_0] : memref<8x64xf32, #tpu.memory_space<vmem>>, vector<8x64xf32>
    %c0_1 = arith.constant 0 : index
    %c0_2 = arith.constant 0 : index
    %1 = vector.load %arg2[%c0_1, %c0_2] : memref<16x64xf32, #tpu.memory_space<vmem>>, vector<16x64xf32>
    %c0_3 = arith.constant 0 : index
    %c0_4 = arith.constant 0 : index
    %2 = vector.load %arg3[%c0_3, %c0_4] : memref<1x64xf32, #tpu.memory_space<vmem>>, vector<1x64xf32>
    %c0_5 = arith.constant 0 : index
    %c0_6 = arith.constant 0 : index
    %3 = vector.load %arg0[%c0_5, %c0_6] : memref<10x8xf32, #tpu.memory_space<vmem>>, vector<10x8xf32>
    %cst = arith.constant dense<0.000000e+00> : vector<10x64xf32>
    %4 = tpu.matmul %3, %0, %cst {dimension_numbers = #tpu.dot_dimension_numbers<[1], [0], [0], [1], [0, 0, 1, 1], [], []>} : vector<10x8xf32>, vector<8x64xf32>, vector<10x64xf32> -> vector<10x64xf32>
    %5 = vector.broadcast %2 : vector<1x64xf32> to vector<10x64xf32>
    %6 = arith.addf %4, %5 : vector<10x64xf32>
    %cst_7 = arith.constant 0.000000e+00 : f32
    %7 = vector.broadcast %cst_7 : f32 to vector<1x16xf32>
    %cst_8 = arith.constant 0.000000e+00 : f32
    %8 = vector.broadcast %cst_8 : f32 to vector<1x16xf32>
    %9 = vector.extract_strided_slice %6 {offsets = [0, 0], sizes = [1, 64], strides = [1, 1]} : vector<10x64xf32> to vector<1x64xf32>
    %cst_9 = arith.constant dense<0.000000e+00> : vector<1x64xf32>
    %10 = tpu.matmul %7, %1, %cst_9 {dimension_numbers = #tpu.dot_dimension_numbers<[1], [0], [0], [1], [0, 0, 1, 1], [], []>} : vector<1x16xf32>, vector<16x64xf32>, vector<1x64xf32> -> vector<1x64xf32>
    %11 = arith.addf %9, %10 : vector<1x64xf32>
    %12 = math.tanh %11 : vector<1x64xf32>
    %cst_10 = arith.constant 5.000000e-01 : f32
    %13 = vector.broadcast %cst_10 : f32 to vector<1x64xf32>
    %14 = arith.mulf %12, %13 : vector<1x64xf32>
    %cst_11 = arith.constant 5.000000e-01 : f32
    %15 = vector.broadcast %cst_11 : f32 to vector<1x64xf32>
    %16 = arith.addf %14, %15 : vector<1x64xf32>
    %17 = vector.extract_strided_slice %16 {offsets = [0, 0], sizes = [1, 16], strides = [1, 1]} : vector<1x64xf32> to vector<1x16xf32>
    %18 = vector.extract_strided_slice %16 {offsets = [0, 16], sizes = [1, 16], strides = [1, 1]} : vector<1x64xf32> to vector<1x16xf32>
    %19 = vector.extract_strided_slice %12 {offsets = [0, 32], sizes = [1, 16], strides = [1, 1]} : vector<1x64xf32> to vector<1x16xf32>
    %20 = vector.extract_strided_slice %16 {offsets = [0, 48], sizes = [1, 16], strides = [1, 1]} : vector<1x64xf32> to vector<1x16xf32>
    %21 = arith.mulf %18, %8 : vector<1x16xf32>
    %22 = arith.mulf %17, %19 : vector<1x16xf32>
    %23 = arith.addf %21, %22 : vector<1x16xf32>
    %24 = math.tanh %23 : vector<1x16xf32>
    %25 = arith.mulf %20, %24 : vector<1x16xf32>
    %c0_12 = arith.constant 0 : index
    %c0_13 = arith.constant 0 : index
    %26 = vector.load %arg4[%c0_12, %c0_13] : memref<10x16xf32, #tpu.memory_space<vmem>>, vector<1x16xf32>
    tpu.vector_store %arg4[%c0_12, %c0_13], %25 {strides = array<i32>} : memref<10x16xf32, #tpu.memory_space<vmem>>, vector<1x16xf32>,
    %27 = vector.extract_strided_slice %6 {offsets = [1, 0], sizes = [1, 64], strides = [1, 1]} : vector<10x64xf32> to vector<1x64xf32>
    %cst_14 = arith.constant dense<0.000000e+00> : vector<1x64xf32>
    %28 = tpu.matmul %25, %1, %cst_14 {dimension_numbers = #tpu.dot_dimension_numbers<[1], [0], [0], [1], [0, 0, 1, 1], [], []>} : vector<1x16xf32>, vector<16x64xf32>, vector<1x64xf32> -> vector<1x64xf32>
    %29 = arith.addf %27, %28 : vector<1x64xf32>
    %30 = math.tanh %29 : vector<1x64xf32>
    %cst_15 = arith.constant 5.000000e-01 : f32
    %31 = vector.broadcast %cst_15 : f32 to vector<1x64xf32>
    %32 = arith.mulf %30, %31 : vector<1x64xf32>
    %cst_16 = arith.constant 5.000000e-01 : f32
    %33 = vector.broadcast %cst_16 : f32 to vector<1x64xf32>
    %34 = arith.addf %32, %33 : vector<1x64xf32>
    %35 = vector.extract_strided_slice %34 {offsets = [0, 0], sizes = [1, 16], strides = [1, 1]} : vector<1x64xf32> to vector<1x16xf32>
    %36 = vector.extract_strided_slice %34 {offsets = [0, 16], sizes = [1, 16], strides = [1, 1]} : vector<1x64xf32> to vector<1x16xf32>
    %37 = vector.extract_strided_slice %30 {offsets = [0, 32], sizes = [1, 16], strides = [1, 1]} : vector<1x64xf32> to vector<1x16xf32>
    %38 = vector.extract_strided_slice %34 {offsets = [0, 48], sizes = [1, 16], strides = [1, 1]} : vector<1x64xf32> to vector<1x16xf32>
    %39 = arith.mulf %36, %23 : vector<1x16xf32>
    %40 = arith.mulf %35, %37 : vector<1x16xf32>
    %41 = arith.addf %39, %40 : vector<1x16xf32>
    %42 = math.tanh %41 : vector<1x16xf32>
    %43 = arith.mulf %38, %42 : vector<1x16xf32>
    %c1 = arith.constant 1 : index
    %c0_17 = arith.constant 0 : index
    %44 = vector.load %arg4[%c1, %c0_17] : memref<10x16xf32, #tpu.memory_space<vmem>>, vector<1x16xf32>
    tpu.vector_store %arg4[%c1, %c0_17], %43 {strides = array<i32>} : memref<10x16xf32, #tpu.memory_space<vmem>>, vector<1x16xf32>,
    %45 = vector.extract_strided_slice %6 {offsets = [2, 0], sizes = [1, 64], strides = [1, 1]} : vector<10x64xf32> to vector<1x64xf32>
    %cst_18 = arith.constant dense<0.000000e+00> : vector<1x64xf32>
    %46 = tpu.matmul %43, %1, %cst_18 {dimension_numbers = #tpu.dot_dimension_numbers<[1], [0], [0], [1], [0, 0, 1, 1], [], []>} : vector<1x16xf32>, vector<16x64xf32>, vector<1x64xf32> -> vector<1x64xf32>
    %47 = arith.addf %45, %46 : vector<1x64xf32>
    %48 = math.tanh %47 : vector<1x64xf32>
    %cst_19 = arith.constant 5.000000e-01 : f32
    %49 = vector.broadcast %cst_19 : f32 to vector<1x64xf32>
    %50 = arith.mulf %48, %49 : vector<1x64xf32>
    %cst_20 = arith.constant 5.000000e-01 : f32
    %51 = vector.broadcast %cst_20 : f32 to vector<1x64xf32>
    %52 = arith.addf %50, %51 : vector<1x64xf32>
    %53 = vector.extract_strided_slice %52 {offsets = [0, 0], sizes = [1, 16], strides = [1, 1]} : vector<1x64xf32> to vector<1x16xf32>
    %54 = vector.extract_strided_slice %52 {offsets = [0, 16], sizes = [1, 16], strides = [1, 1]} : vector<1x64xf32> to vector<1x16xf32>
    %55 = vector.extract_strided_slice %48 {offsets = [0, 32], sizes = [1, 16], strides = [1, 1]} : vector<1x64xf32> to vector<1x16xf32>
    %56 = vector.extract_strided_slice %52 {offsets = [0, 48], sizes = [1, 16], strides = [1, 1]} : vector<1x64xf32> to vector<1x16xf32>
    %57 = arith.mulf %54, %41 : vector<1x16xf32>
    %58 = arith.mulf %53, %55 : vector<1x16xf32>
    %59 = arith.addf %57, %58 : vector<1x16xf32>
    %60 = math.tanh %59 : vector<1x16xf32>
    %61 = arith.mulf %56, %60 : vector<1x16xf32>
    %c2 = arith.constant 2 : index
    %c0_21 = arith.constant 0 : index
    %62 = vector.load %arg4[%c2, %c0_21] : memref<10x16xf32, #tpu.memory_space<vmem>>, vector<1x16xf32>
    tpu.vector_store %arg4[%c2, %c0_21], %61 {strides = array<i32>} : memref<10x16xf32, #tpu.memory_space<vmem>>, vector<1x16xf32>,
    %63 = vector.extract_strided_slice %6 {offsets = [3, 0], sizes = [1, 64], strides = [1, 1]} : vector<10x64xf32> to vector<1x64xf32>
    %cst_22 = arith.constant dense<0.000000e+00> : vector<1x64xf32>
    %64 = tpu.matmul %61, %1, %cst_22 {dimension_numbers = #tpu.dot_dimension_numbers<[1], [0], [0], [1], [0, 0, 1, 1], [], []>} : vector<1x16xf32>, vector<16x64xf32>, vector<1x64xf32> -> vector<1x64xf32>
    %65 = arith.addf %63, %64 : vector<1x64xf32>
    %66 = math.tanh %65 : vector<1x64xf32>
    %cst_23 = arith.constant 5.000000e-01 : f32
    %67 = vector.broadcast %cst_23 : f32 to vector<1x64xf32>
    %68 = arith.mulf %66, %67 : vector<1x64xf32>
    %cst_24 = arith.constant 5.000000e-01 : f32
    %69 = vector.broadcast %cst_24 : f32 to vector<1x64xf32>
    %70 = arith.addf %68, %69 : vector<1x64xf32>
    %71 = vector.extract_strided_slice %70 {offsets = [0, 0], sizes = [1, 16], strides = [1, 1]} : vector<1x64xf32> to vector<1x16xf32>
    %72 = vector.extract_strided_slice %70 {offsets = [0, 16], sizes = [1, 16], strides = [1, 1]} : vector<1x64xf32> to vector<1x16xf32>
    %73 = vector.extract_strided_slice %66 {offsets = [0, 32], sizes = [1, 16], strides = [1, 1]} : vector<1x64xf32> to vector<1x16xf32>
    %74 = vector.extract_strided_slice %70 {offsets = [0, 48], sizes = [1, 16], strides = [1, 1]} : vector<1x64xf32> to vector<1x16xf32>
    %75 = arith.mulf %72, %59 : vector<1x16xf32>
    %76 = arith.mulf %71, %73 : vector<1x16xf32>
    %77 = arith.addf %75, %76 : vector<1x16xf32>
    %78 = math.tanh %77 : vector<1x16xf32>
    %79 = arith.mulf %74, %78 : vector<1x16xf32>
    %c3 = arith.constant 3 : index
    %c0_25 = arith.constant 0 : index
    %80 = vector.load %arg4[%c3, %c0_25] : memref<10x16xf32, #tpu.memory_space<vmem>>, vector<1x16xf32>
    tpu.vector_store %arg4[%c3, %c0_25], %79 {strides = array<i32>} : memref<10x16xf32, #tpu.memory_space<vmem>>, vector<1x16xf32>,
    %81 = vector.extract_strided_slice %6 {offsets = [4, 0], sizes = [1, 64], strides = [1, 1]} : vector<10x64xf32> to vector<1x64xf32>
    %cst_26 = arith.constant dense<0.000000e+00> : vector<1x64xf32>
    %82 = tpu.matmul %79, %1, %cst_26 {dimension_numbers = #tpu.dot_dimension_numbers<[1], [0], [0], [1], [0, 0, 1, 1], [], []>} : vector<1x16xf32>, vector<16x64xf32>, vector<1x64xf32> -> vector<1x64xf32>
    %83 = arith.addf %81, %82 : vector<1x64xf32>
    %84 = math.tanh %83 : vector<1x64xf32>
    %cst_27 = arith.constant 5.000000e-01 : f32
    %85 = vector.broadcast %cst_27 : f32 to vector<1x64xf32>
    %86 = arith.mulf %84, %85 : vector<1x64xf32>
    %cst_28 = arith.constant 5.000000e-01 : f32
    %87 = vector.broadcast %cst_28 : f32 to vector<1x64xf32>
    %88 = arith.addf %86, %87 : vector<1x64xf32>
    %89 = vector.extract_strided_slice %88 {offsets = [0, 0], sizes = [1, 16], strides = [1, 1]} : vector<1x64xf32> to vector<1x16xf32>
    %90 = vector.extract_strided_slice %88 {offsets = [0, 16], sizes = [1, 16], strides = [1, 1]} : vector<1x64xf32> to vector<1x16xf32>
    %91 = vector.extract_strided_slice %84 {offsets = [0, 32], sizes = [1, 16], strides = [1, 1]} : vector<1x64xf32> to vector<1x16xf32>
    %92 = vector.extract_strided_slice %88 {offsets = [0, 48], sizes = [1, 16], strides = [1, 1]} : vector<1x64xf32> to vector<1x16xf32>
    %93 = arith.mulf %90, %77 : vector<1x16xf32>
    %94 = arith.mulf %89, %91 : vector<1x16xf32>
    %95 = arith.addf %93, %94 : vector<1x16xf32>
    %96 = math.tanh %95 : vector<1x16xf32>
    %97 = arith.mulf %92, %96 : vector<1x16xf32>
    %c4 = arith.constant 4 : index
    %c0_29 = arith.constant 0 : index
    %98 = vector.load %arg4[%c4, %c0_29] : memref<10x16xf32, #tpu.memory_space<vmem>>, vector<1x16xf32>
    tpu.vector_store %arg4[%c4, %c0_29], %97 {strides = array<i32>} : memref<10x16xf32, #tpu.memory_space<vmem>>, vector<1x16xf32>,
    %99 = vector.extract_strided_slice %6 {offsets = [5, 0], sizes = [1, 64], strides = [1, 1]} : vector<10x64xf32> to vector<1x64xf32>
    %cst_30 = arith.constant dense<0.000000e+00> : vector<1x64xf32>
    %100 = tpu.matmul %97, %1, %cst_30 {dimension_numbers = #tpu.dot_dimension_numbers<[1], [0], [0], [1], [0, 0, 1, 1], [], []>} : vector<1x16xf32>, vector<16x64xf32>, vector<1x64xf32> -> vector<1x64xf32>
    %101 = arith.addf %99, %100 : vector<1x64xf32>
    %102 = math.tanh %101 : vector<1x64xf32>
    %cst_31 = arith.constant 5.000000e-01 : f32
    %103 = vector.broadcast %cst_31 : f32 to vector<1x64xf32>
    %104 = arith.mulf %102, %103 : vector<1x64xf32>
    %cst_32 = arith.constant 5.000000e-01 : f32
    %105 = vector.broadcast %cst_32 : f32 to vector<1x64xf32>
    %106 = arith.addf %104, %105 : vector<1x64xf32>
    %107 = vector.extract_strided_slice %106 {offsets = [0, 0], sizes = [1, 16], strides = [1, 1]} : vector<1x64xf32> to vector<1x16xf32>
    %108 = vector.extract_strided_slice %106 {offsets = [0, 16], sizes = [1, 16], strides = [1, 1]} : vector<1x64xf32> to vector<1x16xf32>
    %109 = vector.extract_strided_slice %102 {offsets = [0, 32], sizes = [1, 16], strides = [1, 1]} : vector<1x64xf32> to vector<1x16xf32>
    %110 = vector.extract_strided_slice %106 {offsets = [0, 48], sizes = [1, 16], strides = [1, 1]} : vector<1x64xf32> to vector<1x16xf32>
    %111 = arith.mulf %108, %95 : vector<1x16xf32>
    %112 = arith.mulf %107, %109 : vector<1x16xf32>
    %113 = arith.addf %111, %112 : vector<1x16xf32>
    %114 = math.tanh %113 : vector<1x16xf32>
    %115 = arith.mulf %110, %114 : vector<1x16xf32>
    %c5 = arith.constant 5 : index
    %c0_33 = arith.constant 0 : index
    %116 = vector.load %arg4[%c5, %c0_33] : memref<10x16xf32, #tpu.memory_space<vmem>>, vector<1x16xf32>
    tpu.vector_store %arg4[%c5, %c0_33], %115 {strides = array<i32>} : memref<10x16xf32, #tpu.memory_space<vmem>>, vector<1x16xf32>,
    %117 = vector.extract_strided_slice %6 {offsets = [6, 0], sizes = [1, 64], strides = [1, 1]} : vector<10x64xf32> to vector<1x64xf32>
    %cst_34 = arith.constant dense<0.000000e+00> : vector<1x64xf32>
    %118 = tpu.matmul %115, %1, %cst_34 {dimension_numbers = #tpu.dot_dimension_numbers<[1], [0], [0], [1], [0, 0, 1, 1], [], []>} : vector<1x16xf32>, vector<16x64xf32>, vector<1x64xf32> -> vector<1x64xf32>
    %119 = arith.addf %117, %118 : vector<1x64xf32>
    %120 = math.tanh %119 : vector<1x64xf32>
    %cst_35 = arith.constant 5.000000e-01 : f32
    %121 = vector.broadcast %cst_35 : f32 to vector<1x64xf32>
    %122 = arith.mulf %120, %121 : vector<1x64xf32>
    %cst_36 = arith.constant 5.000000e-01 : f32
    %123 = vector.broadcast %cst_36 : f32 to vector<1x64xf32>
    %124 = arith.addf %122, %123 : vector<1x64xf32>
    %125 = vector.extract_strided_slice %124 {offsets = [0, 0], sizes = [1, 16], strides = [1, 1]} : vector<1x64xf32> to vector<1x16xf32>
    %126 = vector.extract_strided_slice %124 {offsets = [0, 16], sizes = [1, 16], strides = [1, 1]} : vector<1x64xf32> to vector<1x16xf32>
    %127 = vector.extract_strided_slice %120 {offsets = [0, 32], sizes = [1, 16], strides = [1, 1]} : vector<1x64xf32> to vector<1x16xf32>
    %128 = vector.extract_strided_slice %124 {offsets = [0, 48], sizes = [1, 16], strides = [1, 1]} : vector<1x64xf32> to vector<1x16xf32>
    %129 = arith.mulf %126, %113 : vector<1x16xf32>
    %130 = arith.mulf %125, %127 : vector<1x16xf32>
    %131 = arith.addf %129, %130 : vector<1x16xf32>
    %132 = math.tanh %131 : vector<1x16xf32>
    %133 = arith.mulf %128, %132 : vector<1x16xf32>
    %c6 = arith.constant 6 : index
    %c0_37 = arith.constant 0 : index
    %134 = vector.load %arg4[%c6, %c0_37] : memref<10x16xf32, #tpu.memory_space<vmem>>, vector<1x16xf32>
    tpu.vector_store %arg4[%c6, %c0_37], %133 {strides = array<i32>} : memref<10x16xf32, #tpu.memory_space<vmem>>, vector<1x16xf32>,
    %135 = vector.extract_strided_slice %6 {offsets = [7, 0], sizes = [1, 64], strides = [1, 1]} : vector<10x64xf32> to vector<1x64xf32>
    %cst_38 = arith.constant dense<0.000000e+00> : vector<1x64xf32>
    %136 = tpu.matmul %133, %1, %cst_38 {dimension_numbers = #tpu.dot_dimension_numbers<[1], [0], [0], [1], [0, 0, 1, 1], [], []>} : vector<1x16xf32>, vector<16x64xf32>, vector<1x64xf32> -> vector<1x64xf32>
    %137 = arith.addf %135, %136 : vector<1x64xf32>
    %138 = math.tanh %137 : vector<1x64xf32>
    %cst_39 = arith.constant 5.000000e-01 : f32
    %139 = vector.broadcast %cst_39 : f32 to vector<1x64xf32>
    %140 = arith.mulf %138, %139 : vector<1x64xf32>
    %cst_40 = arith.constant 5.000000e-01 : f32
    %141 = vector.broadcast %cst_40 : f32 to vector<1x64xf32>
    %142 = arith.addf %140, %141 : vector<1x64xf32>
    %143 = vector.extract_strided_slice %142 {offsets = [0, 0], sizes = [1, 16], strides = [1, 1]} : vector<1x64xf32> to vector<1x16xf32>
    %144 = vector.extract_strided_slice %142 {offsets = [0, 16], sizes = [1, 16], strides = [1, 1]} : vector<1x64xf32> to vector<1x16xf32>
    %145 = vector.extract_strided_slice %138 {offsets = [0, 32], sizes = [1, 16], strides = [1, 1]} : vector<1x64xf32> to vector<1x16xf32>
    %146 = vector.extract_strided_slice %142 {offsets = [0, 48], sizes = [1, 16], strides = [1, 1]} : vector<1x64xf32> to vector<1x16xf32>
    %147 = arith.mulf %144, %131 : vector<1x16xf32>
    %148 = arith.mulf %143, %145 : vector<1x16xf32>
    %149 = arith.addf %147, %148 : vector<1x16xf32>
    %150 = math.tanh %149 : vector<1x16xf32>
    %151 = arith.mulf %146, %150 : vector<1x16xf32>
    %c7 = arith.constant 7 : index
    %c0_41 = arith.constant 0 : index
    %152 = vector.load %arg4[%c7, %c0_41] : memref<10x16xf32, #tpu.memory_space<vmem>>, vector<1x16xf32>
    tpu.vector_store %arg4[%c7, %c0_41], %151 {strides = array<i32>} : memref<10x16xf32, #tpu.memory_space<vmem>>, vector<1x16xf32>,
    %153 = vector.extract_strided_slice %6 {offsets = [8, 0], sizes = [1, 64], strides = [1, 1]} : vector<10x64xf32> to vector<1x64xf32>
    %cst_42 = arith.constant dense<0.000000e+00> : vector<1x64xf32>
    %154 = tpu.matmul %151, %1, %cst_42 {dimension_numbers = #tpu.dot_dimension_numbers<[1], [0], [0], [1], [0, 0, 1, 1], [], []>} : vector<1x16xf32>, vector<16x64xf32>, vector<1x64xf32> -> vector<1x64xf32>
    %155 = arith.addf %153, %154 : vector<1x64xf32>
    %156 = math.tanh %155 : vector<1x64xf32>
    %cst_43 = arith.constant 5.000000e-01 : f32
    %157 = vector.broadcast %cst_43 : f32 to vector<1x64xf32>
    %158 = arith.mulf %156, %157 : vector<1x64xf32>
    %cst_44 = arith.constant 5.000000e-01 : f32
    %159 = vector.broadcast %cst_44 : f32 to vector<1x64xf32>
    %160 = arith.addf %158, %159 : vector<1x64xf32>
    %161 = vector.extract_strided_slice %160 {offsets = [0, 0], sizes = [1, 16], strides = [1, 1]} : vector<1x64xf32> to vector<1x16xf32>
    %162 = vector.extract_strided_slice %160 {offsets = [0, 16], sizes = [1, 16], strides = [1, 1]} : vector<1x64xf32> to vector<1x16xf32>
    %163 = vector.extract_strided_slice %156 {offsets = [0, 32], sizes = [1, 16], strides = [1, 1]} : vector<1x64xf32> to vector<1x16xf32>
    %164 = vector.extract_strided_slice %160 {offsets = [0, 48], sizes = [1, 16], strides = [1, 1]} : vector<1x64xf32> to vector<1x16xf32>
    %165 = arith.mulf %162, %149 : vector<1x16xf32>
    %166 = arith.mulf %161, %163 : vector<1x16xf32>
    %167 = arith.addf %165, %166 : vector<1x16xf32>
    %168 = math.tanh %167 : vector<1x16xf32>
    %169 = arith.mulf %164, %168 : vector<1x16xf32>
    %c8 = arith.constant 8 : index
    %c0_45 = arith.constant 0 : index
    %170 = vector.load %arg4[%c8, %c0_45] : memref<10x16xf32, #tpu.memory_space<vmem>>, vector<1x16xf32>
    tpu.vector_store %arg4[%c8, %c0_45], %169 {strides = array<i32>} : memref<10x16xf32, #tpu.memory_space<vmem>>, vector<1x16xf32>,
    %171 = vector.extract_strided_slice %6 {offsets = [9, 0], sizes = [1, 64], strides = [1, 1]} : vector<10x64xf32> to vector<1x64xf32>
    %cst_46 = arith.constant dense<0.000000e+00> : vector<1x64xf32>
    %172 = tpu.matmul %169, %1, %cst_46 {dimension_numbers = #tpu.dot_dimension_numbers<[1], [0], [0], [1], [0, 0, 1, 1], [], []>} : vector<1x16xf32>, vector<16x64xf32>, vector<1x64xf32> -> vector<1x64xf32>
    %173 = arith.addf %171, %172 : vector<1x64xf32>
    %174 = math.tanh %173 : vector<1x64xf32>
    %cst_47 = arith.constant 5.000000e-01 : f32
    %175 = vector.broadcast %cst_47 : f32 to vector<1x64xf32>
    %176 = arith.mulf %174, %175 : vector<1x64xf32>
    %cst_48 = arith.constant 5.000000e-01 : f32
    %177 = vector.broadcast %cst_48 : f32 to vector<1x64xf32>
    %178 = arith.addf %176, %177 : vector<1x64xf32>
    %179 = vector.extract_strided_slice %178 {offsets = [0, 0], sizes = [1, 16], strides = [1, 1]} : vector<1x64xf32> to vector<1x16xf32>
    %180 = vector.extract_strided_slice %178 {offsets = [0, 16], sizes = [1, 16], strides = [1, 1]} : vector<1x64xf32> to vector<1x16xf32>
    %181 = vector.extract_strided_slice %174 {offsets = [0, 32], sizes = [1, 16], strides = [1, 1]} : vector<1x64xf32> to vector<1x16xf32>
    %182 = vector.extract_strided_slice %178 {offsets = [0, 48], sizes = [1, 16], strides = [1, 1]} : vector<1x64xf32> to vector<1x16xf32>
    %183 = arith.mulf %180, %167 : vector<1x16xf32>
    %184 = arith.mulf %179, %181 : vector<1x16xf32>
    %185 = arith.addf %183, %184 : vector<1x16xf32>
    %186 = math.tanh %185 : vector<1x16xf32>
    %187 = arith.mulf %182, %186 : vector<1x16xf32>
    %c9 = arith.constant 9 : index
    %c0_49 = arith.constant 0 : index
    %188 = vector.load %arg4[%c9, %c0_49] : memref<10x16xf32, #tpu.memory_space<vmem>>, vector<1x16xf32>
    tpu.vector_store %arg4[%c9, %c0_49], %187 {strides = array<i32>} : memref<10x16xf32, #tpu.memory_space<vmem>>, vector<1x16xf32>,
    %c0_50 = arith.constant 0 : index
    %c0_51 = arith.constant 0 : index
    %c0_52 = arith.constant 0 : index
    %189 = vector.load %arg5[%c0_50, %c0_51, %c0_52] : memref<1x1x16xf32, #tpu.memory_space<vmem>>, vector<1x1x16xf32>
    %190 = vector.shape_cast %189 : vector<1x1x16xf32> to vector<1x16xf32>
    %191 = vector.shape_cast %187 : vector<1x16xf32> to vector<1x1x16xf32>
    tpu.vector_store %arg5[%c0_50, %c0_51, %c0_52], %191 {strides = array<i32>} : memref<1x1x16xf32, #tpu.memory_space<vmem>>, vector<1x1x16xf32>,
    %c0_53 = arith.constant 0 : index
    %c0_54 = arith.constant 0 : index
    %c0_55 = arith.constant 0 : index
    %192 = vector.load %arg6[%c0_53, %c0_54, %c0_55] : memref<1x1x16xf32, #tpu.memory_space<vmem>>, vector<1x1x16xf32>
    %193 = vector.shape_cast %192 : vector<1x1x16xf32> to vector<1x16xf32>
    %194 = vector.shape_cast %185 : vector<1x16xf32> to vector<1x1x16xf32>
    tpu.vector_store %arg6[%c0_53, %c0_54, %c0_55], %194 {strides = array<i32>} : memref<1x1x16xf32, #tpu.memory_space<vmem>>, vector<1x1x16xf32>,
    return
  }
}

</mosaic_0001>

<bundles_post_ra>
// kernel: lstm_forward.1
= control target key start
LH: loop header
LB: loop body
LE: loop exit
PB: predicated region body
PF: predicated region fallthrough
CT: control target
= control target key end

     0   :  { %12 = vsyncpa [#allocation3], 0  ;;  %vm31_vm0 = vcmask 64512   ;;  %s1000_s0 = inlined_call_operand.vmem [shape: f32[10,8], index: 0, kind: input, shape index: {}]   ;;  %s1001_s1 = inlined_call_operand.vmem [shape: f32[8,64], index: 1, kind: input, shape index: {}]   ;;  %s1002_s2 = inlined_call_operand.vmem [shape: f32[16,64], index: 2, kind: input, shape index: {}]   ;;  %s1003_s3 = inlined_call_operand.vmem [shape: f32[1,64], index: 3, kind: input, shape index: {}]   ;;  %s1004_s4 = inlined_call_operand.vmem [shape: f32[10,16], index: 4, kind: output, shape index: {0}]   ;;  %s1005_s5 = inlined_call_operand.hbm [shape: f32[1,1,16], index: 5, kind: output, shape index: {1}]   ;;  %s1006_s6 = inlined_call_operand.hbm [shape: f32[1,1,16], index: 6, kind: output, shape index: {2}]  }
   0x1   :  { %v22_v0 = vld [vmem:[%s1001_s1] sm:$0xff]  ;;  %v826_v1 = vld [vmem:[%s1002_s2 + $0x8] sm:$0xff] }
   0x2   :  { %v26_v2 = vld [vmem:[%s1000_s0] sm:$0xff]  ;;  %53 = vmatpush.msra.mxu0 %v22_v0  ;;  %79 = vmatpush.msra.mxu1 %v826_v1 }
   0x3   :  { %v835_v3 = vld [vmem:[%s1002_s2] sm:$0xff]  ;;  %665 = vmatmul.msk.f32.vlgmr.msra.gmra.mxu0 %vm31_vm0, %v26_v2  ;;  %128 = vmatpush.msra.mxu2 %v826_v1 }
   0x4   :  { %13 = vsyncpa [#allocation5], 0  ;;  %80 = vmatpush.msra.mxu1 %v835_v3  ;;  %186 = vmatpush.msra.mxu3 %v826_v1  ;;  %v777_v4 = vmov 0.0   ;;  %v856_v5 = vld [vmem:[%s1003_s3] ss:$0 sm:$0xff]  ;;  %s778_s29 = smov 96  }
   0x5   :  { %81 = vmatmul.f32.vlgmr.msra.gmra.mxu1 %v777_v4  ;;  %129 = vmatpush.msra.mxu2 %v835_v3  ;;  %s779_s30 = smov 16   ;;  %s780_s3 = smov 32   ;;  %vm110_vm1 = vcmask 122880   ;;  %vm61_vm2 = vcmask 130048   ;;  %vm223_vm3 = vcmask 124930   ;;  %vm165_vm4 = vcmask 123905  }
   0x6   :  { %187 = vmatpush.msra.mxu3 %v835_v3  ;;  %244 = vmatpush.msrb.mxu1 %v826_v1  ;;  %s781_s7 = smov 80   ;;  %s782_s15 = smov 112   ;;  %vm339_vm5 = vcmask 126980   ;;  %vm513_vm6 = vcmask 130055   ;;  %vm281_vm7 = vcmask 125955   ;;  %vm455_vm8 = vcmask 129030  }
   0x7   :  { %302 = vmatpush.msrb.mxu2 %v826_v1  ;;  %418 = vmatpush.msrb.mxu0 %v826_v1  ;;  %s783_s18 = smov [#allocation4]   ;;  %s649_s22 = sshll.u32 %s1006_s6, 4  ;;  %vm397_vm9 = vcmask 128005   ;;  %s650_s22 = int_to_ptr.hbm [resolvable:$true] %s649_s22 }
   0x8   :  { %360 = vmatpush.msrb.mxu3 %v826_v1  ;;  %245 = vmatpush.msrb.mxu1 %v835_v3  ;;  %s647_s19 = sshll.u32 %s783_s18, 4  ;;  %s784_s2 = smov [#allocation2]   ;;  %s648_s19 = int_to_ptr.vmem [resolvable:$true] %s647_s19 }
   0x9   :  { %303 = vmatpush.msrb.mxu2 %v835_v3  ;;  %419 = vmatpush.msrb.mxu0 %v835_v3 }
   0xa   :  { %361 = vmatpush.msrb.mxu3 %v835_v3  ;;  %476 = vmatpush.msra.mxu1 %v826_v1 }
   0xc   :  { %477 = vmatpush.msra.mxu1 %v835_v3 }
  0x80   :  { %v55_v6 = vpop.f32.mrf.mxu0 }
  0x81   :  { %v859_v7 = vadd.f32 %v856_v5, %v55_v6 }
  0x82   :  { %v82_v8 = vpop.f32.mrf.mxu1 }
  0x83   :  { %v85_v9 = vadd.f32 %v82_v8, %v859_v7 }
  0x85   :  { %685 = vtanh.f32 %v85_v9 }
  0x8b   :  { %v686_v10 = vpop.eup %685 }
  0x8c   :  { %91 = vrot.lane.b32.xlu0 %v686_v10, %s778_s29  ;;  %v87_v11 = vmul.f32 0.5, %v686_v10 }
  0x8e   :  { %v88_v12 = vadd.f32 0.5, %v87_v11 }
  0x90   :  { %v89_v15 = vmul.f32 0.0, %v88_v12 }
  0xfe   :  { %v92_v13 = vpop.permute.xlu0 %91 }
  0xff   :  { %v94_v14 = vmul.f32 %v92_v13, %v88_v12 }
 0x101   :  { %96 = vrot.lane.b32.xlu0 %v94_v14, %s779_s30 }
 0x173   :  { %v97_v16 = vpop.permute.xlu0 %96 }
 0x174   :  { %v99_v17 = vadd.f32 %v97_v16, %v89_v15 }
 0x176   :  { %687 = vtanh.f32 %v99_v17  ;;  %v142_v30 = vrot.slane %v99_v17, 7 }
 0x17c   :  { %v688_v18 = vpop.eup %687 }
 0x17d   :  { %102 = vrot.lane.b32.xlu1 %v688_v18, %s780_s3 }
 0x1ef   :  { %v103_v19 = vpop.permute.xlu1 %102 }
 0x1f0   :  { %v105_v20 = vmul.f32 %v103_v19, %v88_v12 }
 0x1f2   :  { %107 = vrot.lane.b32.xlu1 %v105_v20, %s781_s7 }
 0x264   :  { %v108_v21 = vpop.permute.xlu1 %107 }
 0x265   :  { %111 = vst.msk [vmem:[%s1004_s4] sm:$0x1] %vm110_vm1, %v108_v21  ;;  %667 = vmatmul.msk.f32.vlgmr.msra.gmra.mxu2 %vm61_vm2, %v108_v21 }
 0x266   :  { %534 = vmatpush.msra.mxu2 %v826_v1 }
 0x268   :  { %535 = vmatpush.msra.mxu2 %v835_v3 }
 0x2e8   :  { %v131_v22 = vpop.f32.mrf.mxu2 }
 0x2e9   :  { %v135_v23 = vrot.slane %v131_v22, 7 }
 0x2eb   :  { %v137_v24 = vadd.f32 %v135_v23, %v859_v7 }
 0x2ed   :  { %689 = vtanh.f32 %v137_v24 }
 0x2f3   :  { %v690_v25 = vpop.eup %689 }
 0x2f4   :  { %146 = vrot.lane.b32.xlu2 %v690_v25, %s778_s29  ;;  %v139_v26 = vmul.f32 0.5, %v690_v25 }
 0x2f6   :  { %v140_v27 = vadd.f32 0.5, %v139_v26 }
 0x2f8   :  { %v144_v31 = vmul.f32 %v142_v30, %v140_v27 }
 0x34e   :  { %v147_v28 = vpop.permute.xlu2 %146 }
 0x34f   :  { %v149_v29 = vmul.f32 %v147_v28, %v140_v27 }
 0x351   :  { %151 = vrot.lane.b32.xlu2 %v149_v29, %s779_s30 }
 0x3ab   :  { %v152_v32 = vpop.permute.xlu2 %151 }
 0x3ac   :  { %v154_v33 = vadd.f32 %v152_v32, %v144_v31 }
 0x3ae   :  { %691 = vtanh.f32 %v154_v33  ;;  %v200_v47 = vrot.slane %v154_v33, 7 }
 0x3b4   :  { %v692_v34 = vpop.eup %691 }
 0x3b5   :  { %157 = vrot.lane.b32.xlu0 %v692_v34, %s780_s3 }
 0x427   :  { %v158_v35 = vpop.permute.xlu0 %157 }
 0x428   :  { %v877_v36 = vmul.f32 %v158_v35, %v140_v27 }
 0x42a   :  { %v167_v37 = vrot.slane %v877_v36, 1 }
 0x42c   :  { %168 = vrot.lane.b32.xlu1 %v167_v37, %s781_s7 }
 0x49e   :  { %v169_v38 = vpop.permute.xlu1 %168 }
 0x49f   :  { %668 = vmatmul.msk.f32.vlgmr.msra.gmra.mxu3 %vm61_vm2, %v169_v38 }
 0x4a0   :  { %585 = vmatpush.msra.mxu3 %v826_v1 }
 0x4a2   :  { %586 = vmatpush.msra.mxu3 %v835_v3 }
 0x522   :  { %v189_v39 = vpop.f32.mrf.mxu3 }
 0x523   :  { %v193_v40 = vrot.slane %v189_v39, 6 }
 0x525   :  { %v195_v41 = vadd.f32 %v193_v40, %v859_v7 }
 0x527   :  { %693 = vtanh.f32 %v195_v41 }
 0x52d   :  { %v694_v42 = vpop.eup %693 }
 0x52e   :  { %204 = vrot.lane.b32.xlu2 %v694_v42, %s778_s29  ;;  %v197_v43 = vmul.f32 0.5, %v694_v42  ;;  %v27_v42 = vld [vmem:[%s1000_s0 + $0x8] sm:$0x3] }
 0x52f   :  { %666 = vmatmul.msk.f32.gmra.mxu0 %vm31_vm0, %v27_v42 }
 0x530   :  { %v198_v44 = vadd.f32 0.5, %v197_v43 }
 0x532   :  { %v202_v48 = vmul.f32 %v200_v47, %v198_v44 }
 0x588   :  { %v205_v45 = vpop.permute.xlu2 %204 }
 0x589   :  { %v207_v46 = vmul.f32 %v205_v45, %v198_v44 }
 0x58b   :  { %209 = vrot.lane.b32.xlu0 %v207_v46, %s779_s30 }
 0x5ac   :  { %v58_v47 = vpop.f32.mrf.mxu0 }
 0x5fd   :  { %v210_v49 = vpop.permute.xlu0 %209 }
 0x5fe   :  { %v212_v50 = vadd.f32 %v210_v49, %v202_v48 }
 0x600   :  { %695 = vtanh.f32 %v212_v50  ;;  %v258_v0 = vrot.slane %v212_v50, 7 }
 0x606   :  { %v696_v51 = vpop.eup %695 }
 0x607   :  { %215 = vrot.lane.b32.xlu1 %v696_v51, %s780_s3 }
 0x679   :  { %v216_v52 = vpop.permute.xlu1 %215 }
 0x67a   :  { %v888_v53 = vmul.f32 %v216_v52, %v198_v44 }
 0x67c   :  { %v225_v54 = vrot.slane %v888_v53, 2 }
 0x67e   :  { %226 = vrot.lane.b32.xlu2 %v225_v54, %s781_s7 }
 0x6d8   :  { %v227_v55 = vpop.permute.xlu2 %226 }
 0x6d9   :  { %669 = vmatmul.msk.f32.vlgmr.msrb.gmra.mxu1 %vm61_vm2, %v227_v55 }
 0x756   :  { %v247_v56 = vpop.f32.mrf.mxu1 }
 0x757   :  { %v251_v57 = vrot.slane %v247_v56, 5 }
 0x759   :  { %v253_v58 = vadd.f32 %v251_v57, %v859_v7 }
 0x75b   :  { %697 = vtanh.f32 %v253_v58 }
 0x761   :  { %v698_v59 = vpop.eup %697 }
 0x762   :  { %262 = vrot.lane.b32.xlu0 %v698_v59, %s778_s29  ;;  %v255_v60 = vmul.f32 0.5, %v698_v59 }
 0x764   :  { %v256_v61 = vadd.f32 0.5, %v255_v60 }
 0x766   :  { %v260_v1 = vmul.f32 %v258_v0, %v256_v61 }
 0x7d4   :  { %v263_v62 = vpop.permute.xlu0 %262 }
 0x7d5   :  { %v265_v63 = vmul.f32 %v263_v62, %v256_v61 }
 0x7d7   :  { %267 = vrot.lane.b32.xlu1 %v265_v63, %s779_s30 }
 0x849   :  { %v268_v2 = vpop.permute.xlu1 %267 }
 0x84a   :  { %v270_v3 = vadd.f32 %v268_v2, %v260_v1 }
 0x84c   :  { %699 = vtanh.f32 %v270_v3  ;;  %v316_v19 = vrot.slane %v270_v3, 7 }
 0x852   :  { %v700_v4 = vpop.eup %699 }
 0x853   :  { %273 = vrot.lane.b32.xlu2 %v700_v4, %s780_s3 }
 0x8ad   :  { %v274_v6 = vpop.permute.xlu2 %273 }
 0x8ae   :  { %v897_v8 = vmul.f32 %v274_v6, %v256_v61 }
 0x8b0   :  { %v283_v9 = vrot.slane %v897_v8, 3 }
 0x8b2   :  { %284 = vrot.lane.b32.xlu0 %v283_v9, %s781_s7 }
 0x924   :  { %v285_v10 = vpop.permute.xlu0 %284 }
 0x925   :  { %670 = vmatmul.msk.f32.vlgmr.msrb.gmra.mxu2 %vm61_vm2, %v285_v10 }
 0x9a8   :  { %v305_v11 = vpop.f32.mrf.mxu2 }
 0x9a9   :  { %v309_v12 = vrot.slane %v305_v11, 4 }
 0x9ab   :  { %v311_v13 = vadd.f32 %v309_v12, %v859_v7 }
 0x9ad   :  { %701 = vtanh.f32 %v311_v13 }
 0x9b3   :  { %v702_v14 = vpop.eup %701 }
 0x9b4   :  { %320 = vrot.lane.b32.xlu1 %v702_v14, %s778_s29  ;;  %v313_v15 = vmul.f32 0.5, %v702_v14 }
 0x9b6   :  { %v314_v16 = vadd.f32 0.5, %v313_v15 }
 0x9b8   :  { %v318_v20 = vmul.f32 %v316_v19, %v314_v16 }
 0xa26   :  { %v321_v17 = vpop.permute.xlu1 %320 }
 0xa27   :  { %v323_v18 = vmul.f32 %v321_v17, %v314_v16 }
 0xa29   :  { %325 = vrot.lane.b32.xlu2 %v323_v18, %s779_s30 }
 0xa83   :  { %v326_v21 = vpop.permute.xlu2 %325 }
 0xa84   :  { %v328_v22 = vadd.f32 %v326_v21, %v318_v20  ;;  %v59_v21 = vadd.f32 %v856_v5, %v58_v47 }
 0xa86   :  { %703 = vtanh.f32 %v328_v22  ;;  %v374_v37 = vrot.slane %v328_v22, 7 }
 0xa8c   :  { %v704_v23 = vpop.eup %703 }
 0xa8d   :  { %331 = vrot.lane.b32.xlu0 %v704_v23, %s780_s3 }
 0xaff   :  { %v332_v24 = vpop.permute.xlu0 %331 }
 0xb00   :  { %v906_v25 = vmul.f32 %v332_v24, %v314_v16 }
 0xb02   :  { %v341_v26 = vrot.slane %v906_v25, 4 }
 0xb04   :  { %342 = vrot.lane.b32.xlu1 %v341_v26, %s781_s7 }
 0xb76   :  { %v343_v27 = vpop.permute.xlu1 %342 }
 0xb77   :  { %671 = vmatmul.msk.f32.vlgmr.msrb.gmra.mxu3 %vm61_vm2, %v343_v27 }
 0xbfa   :  { %v363_v28 = vpop.f32.mrf.mxu3 }
 0xbfb   :  { %v367_v29 = vrot.slane %v363_v28, 3 }
 0xbfd   :  { %v369_v30 = vadd.f32 %v367_v29, %v859_v7 }
 0xbff   :  { %705 = vtanh.f32 %v369_v30 }
 0xc05   :  { %v706_v31 = vpop.eup %705 }
 0xc06   :  { %378 = vrot.lane.b32.xlu2 %v706_v31, %s778_s29  ;;  %v371_v32 = vmul.f32 0.5, %v706_v31 }
 0xc08   :  { %v372_v33 = vadd.f32 0.5, %v371_v32 }
 0xc0a   :  { %v376_v38 = vmul.f32 %v374_v37, %v372_v33 }
 0xc60   :  { %v379_v34 = vpop.permute.xlu2 %378 }
 0xc61   :  { %v381_v35 = vmul.f32 %v379_v34, %v372_v33 }
 0xc63   :  { %383 = vrot.lane.b32.xlu0 %v381_v35, %s779_s30 }
 0xcd5   :  { %v384_v39 = vpop.permute.xlu0 %383 }
 0xcd6   :  { %v386_v40 = vadd.f32 %v384_v39, %v376_v38 }
 0xcd8   :  { %707 = vtanh.f32 %v386_v40  ;;  %v432_v57 = vrot.slane %v386_v40, 7 }
 0xcde   :  { %v708_v41 = vpop.eup %707 }
 0xcdf   :  { %389 = vrot.lane.b32.xlu1 %v708_v41, %s780_s3 }
 0xd51   :  { %v390_v43 = vpop.permute.xlu1 %389 }
 0xd52   :  { %v919_v44 = vmul.f32 %v390_v43, %v372_v33 }
 0xd54   :  { %v399_v45 = vrot.slane %v919_v44, 5 }
 0xd56   :  { %400 = vrot.lane.b32.xlu2 %v399_v45, %s781_s7 }
 0xdb0   :  { %v401_v46 = vpop.permute.xlu2 %400 }
 0xdb1   :  { %672 = vmatmul.msk.f32.vlgmr.msrb.gmra.mxu0 %vm61_vm2, %v401_v46 }
 0xe2e   :  { %v421_v48 = vpop.f32.mrf.mxu0 }
 0xe2f   :  { %v425_v49 = vrot.slane %v421_v48, 2 }
 0xe31   :  { %v427_v50 = vadd.f32 %v425_v49, %v859_v7 }
 0xe33   :  { %709 = vtanh.f32 %v427_v50 }
 0xe39   :  { %v710_v51 = vpop.eup %709 }
 0xe3a   :  { %436 = vrot.lane.b32.xlu0 %v710_v51, %s778_s29  ;;  %v429_v52 = vmul.f32 0.5, %v710_v51 }
 0xe3c   :  { %v430_v54 = vadd.f32 0.5, %v429_v52 }
 0xe3e   :  { %v434_v58 = vmul.f32 %v432_v57, %v430_v54 }
 0xeac   :  { %v437_v55 = vpop.permute.xlu0 %436 }
 0xead   :  { %v439_v56 = vmul.f32 %v437_v55, %v430_v54 }
 0xeaf   :  { %441 = vrot.lane.b32.xlu1 %v439_v56, %s779_s30 }
 0xf21   :  { %v442_v59 = vpop.permute.xlu1 %441 }
 0xf22   :  { %v444_v60 = vadd.f32 %v442_v59, %v434_v58 }
 0xf24   :  { %711 = vtanh.f32 %v444_v60  ;;  %v490_v13 = vrot.slane %v444_v60, 7 }
 0xf2a   :  { %v712_v61 = vpop.eup %711 }
 0xf2b   :  { %447 = vrot.lane.b32.xlu2 %v712_v61, %s780_s3 }
 0xf85   :  { %v448_v62 = vpop.permute.xlu2 %447 }
 0xf86   :  { %v928_v63 = vmul.f32 %v448_v62, %v430_v54 }
 0xf88   :  { %v457_v0 = vrot.slane %v928_v63, 6 }
 0xf8a   :  { %458 = vrot.lane.b32.xlu0 %v457_v0, %s781_s7 }
 0xffc   :  { %v459_v1 = vpop.permute.xlu0 %458 }
 0xffd   :  { %673 = vmatmul.msk.f32.vlgmr.msra.gmra.mxu1 %vm61_vm2, %v459_v1 }
0x107a   :  { %v479_v2 = vpop.f32.mrf.mxu1 }
0x107b   :  { %v483_v3 = vrot.slane %v479_v2, 1 }
0x107d   :  { %v485_v4 = vadd.f32 %v483_v3, %v859_v7 }
0x107f   :  { %713 = vtanh.f32 %v485_v4 }
0x1085   :  { %v714_v6 = vpop.eup %713 }
0x1086   :  { %494 = vrot.lane.b32.xlu1 %v714_v6, %s778_s29  ;;  %v487_v9 = vmul.f32 0.5, %v714_v6 }
0x1088   :  { %v488_v10 = vadd.f32 0.5, %v487_v9 }
0x108a   :  { %v492_v14 = vmul.f32 %v490_v13, %v488_v10 }
0x10f8   :  { %v495_v11 = vpop.permute.xlu1 %494 }
0x10f9   :  { %v497_v12 = vmul.f32 %v495_v11, %v488_v10 }
0x10fb   :  { %499 = vrot.lane.b32.xlu2 %v497_v12, %s779_s30 }
0x1155   :  { %v500_v15 = vpop.permute.xlu2 %499 }
0x1156   :  { %v502_v16 = vadd.f32 %v500_v15, %v492_v14 }
0x1158   :  { %715 = vtanh.f32 %v502_v16  ;;  %v545_v30 = vrot.slane %v502_v16, 7 }
0x115e   :  { %v716_v17 = vpop.eup %715 }
0x115f   :  { %505 = vrot.lane.b32.xlu0 %v716_v17, %s780_s3 }
0x11d1   :  { %v506_v18 = vpop.permute.xlu0 %505 }
0x11d2   :  { %v508_v7 = vmul.f32 %v506_v18, %v488_v10 }
0x11d4   :  { %v515_v19 = vrot.slane %v508_v7, 7 }
0x11d6   :  { %516 = vrot.lane.b32.xlu1 %v515_v19, %s781_s7 }
0x1248   :  { %v517_v20 = vpop.permute.xlu1 %516 }
0x1249   :  { %674 = vmatmul.msk.f32.vlgmr.msra.gmra.mxu2 %vm61_vm2, %v517_v20 }
0x12cc   :  { %v537_v22 = vpop.f32.mrf.mxu2 }
0x12cd   :  { %v540_v23 = vadd.f32 %v537_v22, %v59_v21 }
0x12cf   :  { %717 = vtanh.f32 %v540_v23 }
0x12d5   :  { %v718_v24 = vpop.eup %717 }
0x12d6   :  { %549 = vrot.lane.b32.xlu2 %v718_v24, %s778_s29  ;;  %v542_v26 = vmul.f32 0.5, %v718_v24 }
0x12d8   :  { %v543_v27 = vadd.f32 0.5, %v542_v26 }
0x12da   :  { %v547_v31 = vmul.f32 %v545_v30, %v543_v27 }
0x1330   :  { %v550_v28 = vpop.permute.xlu2 %549 }
0x1331   :  { %v552_v29 = vmul.f32 %v550_v28, %v543_v27 }
0x1333   :  { %554 = vrot.lane.b32.xlu0 %v552_v29, %s779_s30 }
0x13a5   :  { %v555_v32 = vpop.permute.xlu0 %554 }
0x13a6   :  { %v557_v33 = vadd.f32 %v555_v32, %v547_v31 }
0x13a8   :  { %719 = vtanh.f32 %v557_v33  ;;  %v599_v48 = vrot.slane %v557_v33, 7 }
0x13ae   :  { %v720_v34 = vpop.eup %719 }
0x13af   :  { %560 = vrot.lane.b32.xlu1 %v720_v34, %s780_s3 }
0x1421   :  { %v561_v5 = vpop.permute.xlu1 %560 }
0x1422   :  { %v563_v35 = vmul.f32 %v561_v5, %v543_v27 }
0x1424   :  { %565 = vrot.lane.b32.xlu2 %v563_v35, %s781_s7 }
0x147e   :  { %v566_v37 = vpop.permute.xlu2 %565 }
0x147f   :  { %568 = vst.msk [vmem:[%s1004_s4 + $0x8] sm:$0x1] %vm110_vm1, %v566_v37  ;;  %675 = vmatmul.msk.f32.vlgmr.msra.gmra.mxu3 %vm61_vm2, %v566_v37 }
0x1502   :  { %v588_v38 = vpop.f32.mrf.mxu3 }
0x1503   :  { %v592_v39 = vrot.slane %v588_v38, 7 }
0x1505   :  { %v594_v40 = vadd.f32 %v592_v39, %v59_v21 }
0x1507   :  { %721 = vtanh.f32 %v594_v40 }
0x150d   :  { %v722_v41 = vpop.eup %721 }
0x150e   :  { %603 = vrot.lane.b32.xlu0 %v722_v41, %s778_s29  ;;  %v596_v42 = vmul.f32 0.5, %v722_v41  ;;  %s636_s29 = sshll.u32 %s784_s2, 4  ;;  %s637_s29 = int_to_ptr.vmem [resolvable:$true] %s636_s29 }
0x1510   :  { %v597_v43 = vadd.f32 0.5, %v596_v42 }
0x1512   :  { %v601_v49 = vmul.f32 %v599_v48, %v597_v43 }
0x1516   :  { %220 = vrot.lane.b32.xlu0 %v888_v53, %s781_s7 }
0x1580   :  { %v604_v45 = vpop.permute.xlu0 %603 }
0x1581   :  { %v606_v46 = vmul.f32 %v604_v45, %v597_v43 }
0x1583   :  { %608 = vrot.lane.b32.xlu1 %v606_v46, %s779_s30 }
0x1588   :  { %v221_v47 = vpop.permute.xlu0 %220 }
0x1589   :  { %224 = vst.msk [vmem:[%s1004_s4] sm:$0x4] %vm223_vm3, %v221_v47 }
0x15f5   :  { %v609_v50 = vpop.permute.xlu1 %608 }
0x15f6   :  { %v611_v51 = vadd.f32 %v609_v50, %v601_v49 }
0x15f8   :  { %723 = vtanh.f32 %v611_v51  ;;  %625 = vrot.lane.b32.xlu1 %v611_v51, %s782_s15 }
0x15fe   :  { %v724_v53 = vpop.eup %723 }
0x15ff   :  { %614 = vrot.lane.b32.xlu2 %v724_v53, %s780_s3 }
0x1600   :  { %278 = vrot.lane.b32.xlu1 %v897_v8, %s781_s7 }
0x1607   :  { %162 = vrot.lane.b32.xlu2 %v877_v36, %s781_s7 }
0x1608   :  { %452 = vrot.lane.b32.xlu1 %v928_v63, %s781_s7 }
0x160f   :  { %336 = vrot.lane.b32.xlu2 %v906_v25, %s781_s7 }
0x1617   :  { %510 = vrot.lane.b32.xlu2 %v508_v7, %s781_s7 }
0x1659   :  { %v615_v52 = vpop.permute.xlu2 %614 }
0x165a   :  { %v617_v54 = vmul.f32 %v615_v52, %v597_v43 }
0x165c   :  { %619 = vrot.lane.b32.xlu0 %v617_v54, %s781_s7 }
0x1661   :  { %v163_v55 = vpop.permute.xlu2 %162 }
0x1662   :  { %166 = vst.msk [vmem:[%s1004_s4] sm:$0x2] %vm165_vm4, %v163_v55 }
0x1664   :  { %394 = vrot.lane.b32.xlu0 %v919_v44, %s781_s7  ;;  %s638_s7 = sshll.u32 %s1005_s5, 4  ;;  %s639_s7 = int_to_ptr.hbm [resolvable:$true] %s638_s7 }
0x1669   :  { %v337_v36 = vpop.permute.xlu2 %336 }
0x166a   :  { %340 = vst.msk [vmem:[%s1004_s4] sm:$0x10] %vm339_vm5, %v337_v36  ;;  %v626_v8 = vpop.permute.xlu1 %625 }
0x166b   :  { %628 = vst.msk [vmem:[#allocation4 - $0x1] sm:$0x2] %vm165_vm4, %v626_v8 }
0x166c   :  { %652 = dma.vmem_to_hbm [thread:$0]  %s648_s19, 16, %s650_s22, [#allocation5]  }
0x1671   :  { %v511_v25 = vpop.permute.xlu2 %510 }
0x1672   :  { %514 = vst.msk [vmem:[%s1004_s4] sm:$0x80] %vm513_vm6, %v511_v25  ;;  %v279_v44 = vpop.permute.xlu1 %278 }
0x1673   :  { %282 = vst.msk [vmem:[%s1004_s4] sm:$0x8] %vm281_vm7, %v279_v44 }
0x167a   :  { %v453_v56 = vpop.permute.xlu1 %452 }
0x167b   :  { %456 = vst.msk [vmem:[%s1004_s4] sm:$0x40] %vm455_vm8, %v453_v56 }
0x16ce   :  { %v620_v57 = vpop.permute.xlu0 %619 }
0x16cf   :  { %622 = vst.msk [vmem:[%s1004_s4 + $0x8] sm:$0x2] %vm165_vm4, %v620_v57 }
0x16d0   :  { %623 = vst.msk [vmem:[#allocation2 - $0x1] sm:$0x2] %vm165_vm4, %v620_v57 }
0x16d1   :  { %641 = dma.vmem_to_hbm [thread:$0]  %s637_s29, 16, %s639_s7, [#allocation3]  }
0x16d6   :  { %v395_v58 = vpop.permute.xlu0 %394 }
0x16d7   :  { %398 = vst.msk [vmem:[%s1004_s4] sm:$0x20] %vm397_vm9, %v395_v58 }
0x16d8   :  { %773 = dma.done.wait [#allocation3], 16  }
0x16d9   :  { %774 = vsyncadd [#allocation3], 4294967280 }
0x16da   :  { %775 = dma.done.wait [#allocation5], 16  }
0x16db   :  { %776 = vsyncadd [#allocation5], 4294967280 }
0x16dc   :  { %663 = vsyncpa [#allocation3], 1 }
0x16dd   :  { %664 = vsyncpa [#allocation5], 1 }

</bundles_post_ra>
